<compile_context>
chip_gen: v7x
topology: tpu7x:2x2x1
jax: 0.10.0
libtpu: 0.0.40
codegen_flags: <defaults>
</compile_context>

<pallas_src>
import jax
import jax.numpy as jnp
from jax.experimental import pallas as pl
from jax.experimental.pallas import tpu as pltpu


def convexnn_kernel(w_ref, a_ref, d_ref, x_ref, o_ref):
    # w_ref: SMEM (3, 3)      weight matrix W
    # a_ref: SMEM (3,)        a_b
    # d_ref: SMEM (3,)        d_e
    # x_ref: VMEM (3, TILE_R, 128)   per-feature slabs of the input tile
    # o_ref: VMEM (TILE_R, 128)      per-element sum
    l0 = jnp.log(x_ref[0])          # (TILE_R, 128)  EUP
    l1 = jnp.log(x_ref[1])
    l2 = jnp.log(x_ref[2])

    acc = None
    for j in range(3):              # unrolled: 9 scalar-broadcast FMAs + 3 exps
        z = w_ref[j, 0] * l0 + w_ref[j, 1] * l1 + w_ref[j, 2] * l2
        term = a_ref[j] * (jnp.exp(z) + d_ref[j])
        acc = term if acc is None else acc + term

    o_ref[...] = acc


def convexnn_forward(x, W, a_b, d_e, *, tile_rows=512):
    """x: (B, S, 3) strictly-positive float32. Returns (B, S) float32."""
    B, S, F = x.shape
    assert F == 3, "ConvexNN forward expects 3 features"
    N = B * S

    # Rows of 128 lanes; pad row count to a multiple of 8 (sublane tile) and
    # to a multiple of the tile size.
    r = pl.cdiv(N, 128)
    r8 = pl.cdiv(r, 8) * 8
    tile_r = min(tile_rows, r8)          # both multiples of 8
    r_pad = pl.cdiv(r8, tile_r) * tile_r
    n_pad = r_pad * 128

    # (B, S, 3) -> (3, N) -> pad tail with 1.0 (log(1)=0, finite) -> (3, R, 128)
    xt = x.reshape(N, F).astype(jnp.float32).T
    xt = jnp.pad(xt, ((0, 0), (0, n_pad - N)), constant_values=1.0)
    x_in = xt.reshape(F, r_pad, 128)

    grid = (r_pad // tile_r,)

    out = pl.pallas_call(
        convexnn_kernel,
        out_shape=jax.ShapeDtypeStruct((r_pad, 128), jnp.float32),
        grid=grid,
        in_specs=[
            pl.BlockSpec(memory_space=pltpu.MemorySpace.SMEM),      # W (3,3)
            pl.BlockSpec(memory_space=pltpu.MemorySpace.SMEM),      # a_b (3,)
            pl.BlockSpec(memory_space=pltpu.MemorySpace.SMEM),      # d_e (3,)
            pl.BlockSpec((F, tile_r, 128), lambda i: (0, i, 0)),    # x tile
        ],
        out_specs=pl.BlockSpec((tile_r, 128), lambda i: (i, 0)),
        compiler_params=pltpu.CompilerParams(
            dimension_semantics=("parallel",)),
    )(W.astype(jnp.float32), a_b.astype(jnp.float32),
      d_e.astype(jnp.float32), x_in)

    # Padded lanes hold sum_j a_j*(1+d_j); the [:N] slice discards them.
    return out.reshape(-1)[:N].reshape(B, S)


def convexnn_reference(x, W, a_b, d_e):
    logx = jnp.log(x)
    e = jnp.exp(jnp.einsum("bsf,jf->bsj", logx, W))
    return jnp.sum(a_b * (e + d_e), axis=2)


if __name__ == "__main__":
    # Deterministic parameters (exactly the module's __init__ values).
    W = jnp.array([[1.0, 0.0, -2.0 / 3.0],
                   [0.0, 1.0, -4.0 / 3.0],
                   [0.0, 0.0, 1.0]], dtype=jnp.float32)
    bias_exp = jnp.array([0.0, 0.0, 0.0], dtype=jnp.float32)  # declared in __init__, unused in forward
    a_b = jnp.array([1.0, 1.0, 1.0], dtype=jnp.float32)
    d_e = jnp.array([-3.0, -3.0, 0.0], dtype=jnp.float32)

    # Small deterministic input: batch=2, seq=8, features=3 (strictly positive).
    key = jax.random.PRNGKey(0)
    x = jax.random.uniform(key, (2, 8, 3), dtype=jnp.float32, minval=0.5, maxval=2.0)

    out = convexnn_forward(x, W, a_b, d_e)
    out = jax.block_until_ready(out)

    ref = convexnn_reference(x, W, a_b, d_e)
    assert out.shape == (2, 8)
    assert jnp.allclose(out, ref, rtol=1e-5, atol=1e-5), (out, ref)

    print("KERNEL_OK")
</pallas_src>

<mosaic_0001>
module attributes {stable_mosaic.version = 11 : i64} {
  func.func @convexnn_kernel(%arg0: i32, %arg1: memref<3x3xf32, #tpu.memory_space<smem>>, %arg2: memref<3xf32, #tpu.memory_space<smem>>, %arg3: memref<3xf32, #tpu.memory_space<smem>>, %arg4: memref<3x8x128xf32, #tpu.memory_space<vmem>>, %arg5: memref<8x128xf32, #tpu.memory_space<vmem>>) attributes {dimension_semantics = [#tpu.dimension_semantics<parallel>], iteration_bounds = array<i64: 1>, scalar_prefetch = 0 : i64, scratch_operands = 0 : i64, tpu.core_type = #tpu.core_type<tc>, window_params = [{transform_indices = @transform_0, window_bounds = array<i64: 3, 3>}, {transform_indices = @transform_1, window_bounds = array<i64: 3>}, {transform_indices = @transform_2, window_bounds = array<i64: 3>}, {transform_indices = @transform_3, window_bounds = array<i64: 3, 8, 128>}, {transform_indices = @transform_4, window_bounds = array<i64: 8, 128>}]} {
    %c0 = arith.constant 0 : index
    %c0_0 = arith.constant 0 : index
    %c0_1 = arith.constant 0 : index
    %0 = vector.load %arg4[%c0, %c0_0, %c0_1] : memref<3x8x128xf32, #tpu.memory_space<vmem>>, vector<1x8x128xf32>
    %1 = vector.shape_cast %0 : vector<1x8x128xf32> to vector<8x128xf32>
    %2 = math.log %1 : vector<8x128xf32>
    %c1 = arith.constant 1 : index
    %c0_2 = arith.constant 0 : index
    %c0_3 = arith.constant 0 : index
    %3 = vector.load %arg4[%c1, %c0_2, %c0_3] : memref<3x8x128xf32, #tpu.memory_space<vmem>>, vector<1x8x128xf32>
    %4 = vector.shape_cast %3 : vector<1x8x128xf32> to vector<8x128xf32>
    %5 = math.log %4 : vector<8x128xf32>
    %c2 = arith.constant 2 : index
    %c0_4 = arith.constant 0 : index
    %c0_5 = arith.constant 0 : index
    %6 = vector.load %arg4[%c2, %c0_4, %c0_5] : memref<3x8x128xf32, #tpu.memory_space<vmem>>, vector<1x8x128xf32>
    %7 = vector.shape_cast %6 : vector<1x8x128xf32> to vector<8x128xf32>
    %8 = math.log %7 : vector<8x128xf32>
    %c0_6 = arith.constant 0 : index
    %c0_7 = arith.constant 0 : index
    %9 = memref.load %arg1[%c0_6, %c0_7] : memref<3x3xf32, #tpu.memory_space<smem>>
    %10 = vector.broadcast %9 : f32 to vector<8x128xf32>
    %11 = arith.mulf %10, %2 : vector<8x128xf32>
    %c0_8 = arith.constant 0 : index
    %c1_9 = arith.constant 1 : index
    %12 = memref.load %arg1[%c0_8, %c1_9] : memref<3x3xf32, #tpu.memory_space<smem>>
    %13 = vector.broadcast %12 : f32 to vector<8x128xf32>
    %14 = arith.mulf %13, %5 : vector<8x128xf32>
    %15 = arith.addf %11, %14 : vector<8x128xf32>
    %c0_10 = arith.constant 0 : index
    %c2_11 = arith.constant 2 : index
    %16 = memref.load %arg1[%c0_10, %c2_11] : memref<3x3xf32, #tpu.memory_space<smem>>
    %17 = vector.broadcast %16 : f32 to vector<8x128xf32>
    %18 = arith.mulf %17, %8 : vector<8x128xf32>
    %19 = arith.addf %15, %18 : vector<8x128xf32>
    %c0_12 = arith.constant 0 : index
    %20 = memref.load %arg2[%c0_12] : memref<3xf32, #tpu.memory_space<smem>>
    %21 = math.exp %19 : vector<8x128xf32>
    %c0_13 = arith.constant 0 : index
    %22 = memref.load %arg3[%c0_13] : memref<3xf32, #tpu.memory_space<smem>>
    %23 = vector.broadcast %22 : f32 to vector<8x128xf32>
    %24 = arith.addf %21, %23 : vector<8x128xf32>
    %25 = vector.broadcast %20 : f32 to vector<8x128xf32>
    %26 = arith.mulf %25, %24 : vector<8x128xf32>
    %c1_14 = arith.constant 1 : index
    %c0_15 = arith.constant 0 : index
    %27 = memref.load %arg1[%c1_14, %c0_15] : memref<3x3xf32, #tpu.memory_space<smem>>
    %28 = vector.broadcast %27 : f32 to vector<8x128xf32>
    %29 = arith.mulf %28, %2 : vector<8x128xf32>
    %c1_16 = arith.constant 1 : index
    %c1_17 = arith.constant 1 : index
    %30 = memref.load %arg1[%c1_16, %c1_17] : memref<3x3xf32, #tpu.memory_space<smem>>
    %31 = vector.broadcast %30 : f32 to vector<8x128xf32>
    %32 = arith.mulf %31, %5 : vector<8x128xf32>
    %33 = arith.addf %29, %32 : vector<8x128xf32>
    %c1_18 = arith.constant 1 : index
    %c2_19 = arith.constant 2 : index
    %34 = memref.load %arg1[%c1_18, %c2_19] : memref<3x3xf32, #tpu.memory_space<smem>>
    %35 = vector.broadcast %34 : f32 to vector<8x128xf32>
    %36 = arith.mulf %35, %8 : vector<8x128xf32>
    %37 = arith.addf %33, %36 : vector<8x128xf32>
    %c1_20 = arith.constant 1 : index
    %38 = memref.load %arg2[%c1_20] : memref<3xf32, #tpu.memory_space<smem>>
    %39 = math.exp %37 : vector<8x128xf32>
    %c1_21 = arith.constant 1 : index
    %40 = memref.load %arg3[%c1_21] : memref<3xf32, #tpu.memory_space<smem>>
    %41 = vector.broadcast %40 : f32 to vector<8x128xf32>
    %42 = arith.addf %39, %41 : vector<8x128xf32>
    %43 = vector.broadcast %38 : f32 to vector<8x128xf32>
    %44 = arith.mulf %43, %42 : vector<8x128xf32>
    %45 = arith.addf %26, %44 : vector<8x128xf32>
    %c2_22 = arith.constant 2 : index
    %c0_23 = arith.constant 0 : index
    %46 = memref.load %arg1[%c2_22, %c0_23] : memref<3x3xf32, #tpu.memory_space<smem>>
    %47 = vector.broadcast %46 : f32 to vector<8x128xf32>
    %48 = arith.mulf %47, %2 : vector<8x128xf32>
    %c2_24 = arith.constant 2 : index
    %c1_25 = arith.constant 1 : index
    %49 = memref.load %arg1[%c2_24, %c1_25] : memref<3x3xf32, #tpu.memory_space<smem>>
    %50 = vector.broadcast %49 : f32 to vector<8x128xf32>
    %51 = arith.mulf %50, %5 : vector<8x128xf32>
    %52 = arith.addf %48, %51 : vector<8x128xf32>
    %c2_26 = arith.constant 2 : index
    %c2_27 = arith.constant 2 : index
    %53 = memref.load %arg1[%c2_26, %c2_27] : memref<3x3xf32, #tpu.memory_space<smem>>
    %54 = vector.broadcast %53 : f32 to vector<8x128xf32>
    %55 = arith.mulf %54, %8 : vector<8x128xf32>
    %56 = arith.addf %52, %55 : vector<8x128xf32>
    %c2_28 = arith.constant 2 : index
    %57 = memref.load %arg2[%c2_28] : memref<3xf32, #tpu.memory_space<smem>>
    %58 = math.exp %56 : vector<8x128xf32>
    %c2_29 = arith.constant 2 : index
    %59 = memref.load %arg3[%c2_29] : memref<3xf32, #tpu.memory_space<smem>>
    %60 = vector.broadcast %59 : f32 to vector<8x128xf32>
    %61 = arith.addf %58, %60 : vector<8x128xf32>
    %62 = vector.broadcast %57 : f32 to vector<8x128xf32>
    %63 = arith.mulf %62, %61 : vector<8x128xf32>
    %64 = arith.addf %45, %63 : vector<8x128xf32>
    %c0_30 = arith.constant 0 : index
    %c0_31 = arith.constant 0 : index
    %65 = vector.load %arg5[%c0_30, %c0_31] : memref<8x128xf32, #tpu.memory_space<vmem>>, vector<8x128xf32>
    tpu.vector_store %arg5[%c0_30, %c0_31], %64 {strides = array<i32>} : memref<8x128xf32, #tpu.memory_space<vmem>>, vector<8x128xf32>,
    return
  }
  func.func @transform_0(%arg0: i32) -> (i32, i32) {
    %c0_i32 = arith.constant 0 : i32
    %c0_i32_0 = arith.constant 0 : i32
    %c0_i32_1 = arith.constant 0 : i32
    return %c0_i32, %c0_i32_0 : i32, i32
  }
  func.func @transform_1(%arg0: i32) -> i32 {
    %c0_i32 = arith.constant 0 : i32
    %c0_i32_0 = arith.constant 0 : i32
    return %c0_i32 : i32
  }
  func.func @transform_2(%arg0: i32) -> i32 {
    %c0_i32 = arith.constant 0 : i32
    %c0_i32_0 = arith.constant 0 : i32
    return %c0_i32 : i32
  }
  func.func @transform_3(%arg0: i32) -> (i32, i32, i32) {
    %c0_i32 = arith.constant 0 : i32
    %c0_i32_0 = arith.constant 0 : i32
    %c0_i32_1 = arith.constant 0 : i32
    return %c0_i32, %arg0, %c0_i32_0 : i32, i32, i32
  }
  func.func @transform_4(%arg0: i32) -> (i32, i32) {
    %c0_i32 = arith.constant 0 : i32
    %c0_i32_0 = arith.constant 0 : i32
    return %arg0, %c0_i32 : i32, i32
  }
}

</mosaic_0001>

<bundles_post_ra>
// kernel: tpu_custom_call.1
= control target key start
LH: loop header
LB: loop body
LE: loop exit
PB: predicated region body
PF: predicated region fallthrough
CT: control target
= control target key end

     0   :  { %9 = vsyncpa [#allocation5], 0  ;;  %s349_s0 = inlined_call_operand.hbm [shape: f32[3,3], index: 0, kind: input, shape index: {}]   ;;  %s350_s1 = inlined_call_operand.vmem [shape: f32[3], index: 1, kind: input, shape index: {}]   ;;  %s351_s2 = inlined_call_operand.vmem [shape: f32[3], index: 2, kind: input, shape index: {}]   ;;  %s352_s3 = inlined_call_operand.hbm [shape: f32[3,8,128], index: 3, kind: input, shape index: {}]   ;;  %s353_s4 = inlined_call_operand.hbm [shape: f32[8,128], index: 4, kind: output, shape index: {}]  }
   0x1   :  { %10 = vsyncpa [#allocation6], 0 }
   0x2   :  { %11 = vsyncpa [#allocation9], 0 }
   0x3   :  { %12 = vsyncpa [#allocation3], 0 }
   0x4   :  { %13 = vsyncpa [#allocation4], 0  ;;  %s28_s17 = sshll.u32 %s350_s1, 4  ;;  %s187_s20 = scalar_lea.hbm %s349_s0, 64  ;;  %s29_s17 = int_to_ptr.vmem [resolvable:$true] %s28_s17 }
   0x5   :  { %p188_p0 = scmp.ne.s32.totalorder %s349_s0, %s187_s20  ;;  %p191_p1 = scmp.lt.u32.totalorder %s187_s20, %s349_s0 }
   0x7   :  { %p193_p2 = pnand %p191_p1, %p188_p0 }
   0x9   :  { %196 = shalt.err (!%p193_p2)
}
   0xa   :  { %s275_s25 = smov [#allocation2]   ;;  %s197_s1 = scalar_lea.vmem %s29_s17, 16 }
   0xb   :  { %21 = dma.hbm_to_smem %s349_s0, 64, %s275_s25, [#allocation5]  }
   0xc   :  { %p198_p3 = scmp.ne.s32.totalorder %s29_s17, %s197_s1  ;;  %p202_p4 = scmp.lt.s32.totalorder %s29_s17, %s29_s17 }
   0xd   :  { %p203_p5 = scmp.lt.s32.totalorder %s197_s1, %s197_s1 }
   0xf   :  { %p204_p6 = por %p203_p5, %p202_p4 }
  0x11   :  { %p205_p7 = pnand %p204_p6, %p198_p3 }
  0x13   :  { %208 = shalt.err (!%p205_p7)
}
  0x14   :  { %s276_s28 = smov [#allocation7]   ;;  %s38_s5 = sshll.u32 %s351_s2, 4  ;;  %s39_s5 = int_to_ptr.vmem [resolvable:$true] %s38_s5 }
  0x15   :  { %31 = dma.vmem_to_smem %s29_s17, 16, %s276_s28, [#allocation6]  }
  0x16   :  { %s209_s6 = scalar_lea.vmem %s39_s5, 16  ;;  %p214_p9 = scmp.lt.s32.totalorder %s39_s5, %s39_s5 }
  0x17   :  { %p210_p8 = scmp.ne.s32.totalorder %s39_s5, %s209_s6  ;;  %p215_p10 = scmp.lt.s32.totalorder %s209_s6, %s209_s6 }
  0x19   :  { %p216_p11 = por %p215_p10, %p214_p9 }
  0x1b   :  { %p217_p12 = pnand %p216_p11, %p210_p8 }
  0x1d   :  { %220 = shalt.err (!%p217_p12)
}
  0x1e   :  { %s277_s0 = smov [#allocation8]   ;;  %s278_s7 = smov [#allocation10]  }
  0x1f   :  { %41 = dma.vmem_to_smem %s39_s5, 16, %s277_s0, [#allocation9]  }
  0x20   :  { %s47_s8 = sshll.u32 %s278_s7, 4  ;;  %s221_s11 = scalar_lea.hbm %s352_s3, 384  ;;  %s48_s8 = int_to_ptr.vmem [resolvable:$true] %s47_s8 }
  0x21   :  { %p222_p13 = scmp.ne.s32.totalorder %s352_s3, %s221_s11  ;;  %p225_p0 = scmp.lt.u32.totalorder %s221_s11, %s352_s3 }
  0x23   :  { %p227_p1 = pnand %p225_p0, %p222_p13 }
  0x25   :  { %230 = shalt.err (!%p227_p1)
}
  0x26   :  { %s231_s15 = scalar_lea.vmem %s48_s8, 384  ;;  %p236_p3 = scmp.lt.s32.totalorder %s48_s8, %s48_s8 }
  0x27   :  { %p232_p2 = scmp.ne.s32.totalorder %s48_s8, %s231_s15  ;;  %p237_p4 = scmp.lt.s32.totalorder %s231_s15, %s231_s15 }
  0x29   :  { %p238_p5 = por %p237_p4, %p236_p3 }
  0x2b   :  { %p239_p6 = pnand %p238_p5, %p232_p2 }
  0x2d   :  { %242 = shalt.err (!%p239_p6)
}
  0x2e   :  { %s279_s16 = smov 128   ;;  %s280_s17 = smov 8  }
  0x2f   :  { %53 = dma.hbm_to_vmem [thread:$0]  %s352_s3, 384, %s48_s8, [#allocation3], %s279_s16, %s279_s16, %s280_s17  }
  0x30   :  { %265 = dma.done.wait [#allocation5], 64  }
  0x31   :  { %266 = vsyncadd [#allocation5], 4294967232 }
  0x32   :  { %267 = dma.done.wait [#allocation6], 16  }
  0x33   :  { %268 = vsyncadd [#allocation6], 4294967280 }
  0x34   :  { %269 = dma.done.wait [#allocation9], 16  }
  0x35   :  { %270 = vsyncadd [#allocation9], 4294967280 }
  0x36   :  { %271 = dma.done.wait [#allocation3], 384  }
  0x37   :  { %272 = vsyncadd [#allocation3], 4294966912 }
  0x38   :  { %66 = sfence }
  0x39   :  { %v67_v0 = vld [vmem:[#allocation10] sm:$0xff]  ;;  %v71_v1 = vld [vmem:[#allocation10 + $0x8] sm:$0xff]  ;;  %v75_v2 = vld [vmem:[#allocation10 + $0x10] sm:$0xff]  ;;  %s78_s20 = sld [smem:[#allocation2]]  ;;  %s156_s21 = sld [smem:[#allocation2 + $0x1]] }
  0x3a   :  { %175 = vlog2.f32 %v67_v0  ;;  %s158_s22 = sld [smem:[#allocation2 + $0x80]]  ;;  %s157_s23 = sld [smem:[#allocation2 + $0x2]] }
  0x3b   :  { %177 = vlog2.f32 %v71_v1  ;;  %s159_s3 = sld [smem:[#allocation2 + $0x81]]  ;;  %s160_s24 = sld [smem:[#allocation2 + $0x82]] }
  0x3c   :  { %179 = vlog2.f32 %v75_v2  ;;  %s163_s25 = sld [smem:[#allocation2 + $0x100]]  ;;  %s164_s26 = sld [smem:[#allocation2 + $0x101]] }
  0x3d   :  { %s165_s27 = sld [smem:[#allocation2 + $0x102]]  ;;  %s92_s1 = sld [smem:[#allocation8]] }
  0x3e   :  { %s162_s28 = sld [smem:[#allocation8 + $0x1]]  ;;  %s89_s29 = sld [smem:[#allocation7]] }
  0x3f   :  { %v79_v4 = vstv %s78_s20  ;;  %v82_v9 = vstv %s156_s21  ;;  %s167_s30 = sld [smem:[#allocation8 + $0x2]]  ;;  %s161_s5 = sld [smem:[#allocation7 + $0x1]] }
  0x40   :  { %v98_v5 = vstv %s158_s22  ;;  %v86_v14 = vstv %s157_s23  ;;  %s166_s6 = sld [smem:[#allocation7 + $0x2]]  ;;  %s281_s0 = smov [#allocation11]  }
  0x41   :  { %v101_v10 = vstv %s159_s3  ;;  %v105_v15 = vstv %s160_s24  ;;  %s144_s7 = sshll.u32 %s281_s0, 4  ;;  %s145_s7 = int_to_ptr.vmem [resolvable:$true] %s144_s7 }
  0x42   :  { %v118_v6 = vstv %s163_s25  ;;  %v121_v11 = vstv %s164_s26  ;;  %s243_s8 = scalar_lea.vmem %s145_s7, 128  ;;  %p248_p8 = scmp.lt.s32.totalorder %s145_s7, %s145_s7 }
  0x43   :  { %v125_v16 = vstv %s165_s27  ;;  %v93_v36 = vstv %s92_s1  ;;  %p244_p7 = scmp.ne.s32.totalorder %s145_s7, %s243_s8  ;;  %p249_p9 = scmp.lt.s32.totalorder %s243_s8, %s243_s8 }
  0x44   :  { %v176_v3 = vpop.eup %175  ;;  %v112_v37 = vstv %s162_s28  ;;  %v95_v39 = vstv %s89_s29 }
  0x45   :  { %v178_v7 = vpop.eup %177  ;;  %v69_v8 = vmul.f32 0.6931472, %v176_v3  ;;  %v132_v40 = vstv %s167_s30  ;;  %v114_v43 = vstv %s161_s5  ;;  %p250_p10 = por %p249_p9, %p248_p8 }
  0x46   :  { %v180_v12 = vpop.eup %179  ;;  %v73_v13 = vmul.f32 0.6931472, %v178_v7  ;;  %v134_v46 = vstv %s166_s6 }
  0x47   :  { %v77_v17 = vmul.f32 0.6931472, %v180_v12  ;;  %v80_v18 = vmul.f32 %v79_v4, %v69_v8  ;;  %v99_v19 = vmul.f32 %v98_v5, %v69_v8  ;;  %v119_v20 = vmul.f32 %v118_v6, %v69_v8  ;;  %p251_p11 = pnand %p250_p10, %p244_p7 }
  0x48   :  { %v83_v21 = vmul.f32 %v82_v9, %v73_v13  ;;  %v102_v22 = vmul.f32 %v101_v10, %v73_v13  ;;  %v122_v23 = vmul.f32 %v121_v11, %v73_v13 }
  0x49   :  { %v87_v24 = vmul.f32 %v86_v14, %v77_v17  ;;  %v106_v25 = vmul.f32 %v105_v15, %v77_v17  ;;  %v126_v26 = vmul.f32 %v125_v16, %v77_v17 }
  0x4a   :  { %v84_v27 = vadd.f32 %v83_v21, %v80_v18  ;;  %v103_v28 = vadd.f32 %v102_v22, %v99_v19  ;;  %v123_v29 = vadd.f32 %v122_v23, %v119_v20 }
  0x4c   :  { %v88_v30 = vadd.f32 %v87_v24, %v84_v27  ;;  %v107_v31 = vadd.f32 %v106_v25, %v103_v28  ;;  %v127_v32 = vadd.f32 %v126_v26, %v123_v29 }
  0x4e   :  { %v90_v33 = vmul.f32 1.442695, %v88_v30  ;;  %v109_v34 = vmul.f32 1.442695, %v107_v31  ;;  %v129_v35 = vmul.f32 1.442695, %v127_v32 }
  0x50   :  { %181 = vpow2.f32 %v90_v33 }
  0x51   :  { %183 = vpow2.f32 %v109_v34 }
  0x52   :  { %185 = vpow2.f32 %v129_v35 }
  0x5a   :  { %v182_v38 = vpop.eup %181 }
  0x5b   :  { %v184_v41 = vpop.eup %183  ;;  %v94_v42 = vadd.f32 %v182_v38, %v93_v36 }
  0x5c   :  { %v186_v44 = vpop.eup %185  ;;  %v113_v45 = vadd.f32 %v184_v41, %v112_v37 }
  0x5d   :  { %v96_v47 = vmul.f32 %v95_v39, %v94_v42  ;;  %v133_v48 = vadd.f32 %v186_v44, %v132_v40 }
  0x5e   :  { %v115_v49 = vmul.f32 %v114_v43, %v113_v45 }
  0x5f   :  { %v135_v50 = vmul.f32 %v134_v46, %v133_v48 }
  0x60   :  { %v116_v51 = vadd.f32 %v115_v49, %v96_v47 }
  0x62   :  { %v136_v52 = vadd.f32 %v135_v50, %v116_v51 }
  0x64   :  { %137 = vst [vmem:[#allocation11] sm:$0xff] %v136_v52 }
  0x65   :  { %254 = shalt.err (!%p251_p11)
}
  0x66   :  { %s255_s11 = scalar_lea.hbm %s353_s4, 128 }
  0x67   :  { %p256_p12 = scmp.ne.s32.totalorder %s353_s4, %s255_s11  ;;  %p259_p13 = scmp.lt.u32.totalorder %s255_s11, %s353_s4 }
  0x69   :  { %p261_p0 = pnand %p259_p13, %p256_p12 }
  0x6b   :  { %264 = shalt.err (!%p261_p0)
}
  0x6c   :  { %147 = dma.vmem_to_hbm [thread:$0]  %s145_s7, 128, %s353_s4, [#allocation4]  }
  0x6d   :  { %273 = dma.done.wait [#allocation4], 128  }
  0x6e   :  { %274 = vsyncadd [#allocation4], 4294967168 }
  0x6f   :  { %151 = vsyncpa [#allocation3], 1 }
  0x70   :  { %152 = vsyncpa [#allocation4], 1 }
  0x71   :  { %153 = vsyncpa [#allocation5], 1 }
  0x72   :  { %154 = vsyncpa [#allocation6], 1 }
  0x73   :  { %155 = vsyncpa [#allocation9], 1 }

</bundles_post_ra>
